<compile_context>
chip_gen: v6e
topology: v6e:2x2x1
jax: 0.10.0
libtpu: 0.0.40
codegen_flags: <defaults>
</compile_context>

<pallas_src>
import functools

import jax
import jax.numpy as jnp
from jax.experimental import pallas as pl
from jax.experimental.pallas import tpu as pltpu


def _round_up(x, m):
    return (x + m - 1) // m * m


# ----------------------------------------------------------------------------
# Kernel
# ----------------------------------------------------------------------------
def coupling_kernel(x_ref, w_ref, p_ref, out_ref, *,
                    num_inputs, num_hidden, r_w2, r_w3, mode):
    D = num_inputs
    H = num_hidden
    H2 = 2 * H

    x = x_ref[...]                                      # (TB, D) f32
    m = p_ref[3:4, 0:D]                                 # (1, D) f32 mask
    imask = 1.0 - m
    xm = x * m                                          # masked_inputs (f32)

    b1 = p_ref[0:1, :]                                  # (1, 2H) f32
    b2 = p_ref[1:2, :]
    b3 = p_ref[2:3, :]                                  # lanes [0,2D) real

    # Per-lane activation: lanes [0,H) = scale net (tanh), [H,2H) = translate
    # net (relu).  (1, 2H) selector row broadcasts over the batch tile.
    # NOTE: tanh-on-everything-then-select is fine while 2H <= 128 lanes; if H
    # is ever scaled to >=128, evaluate tanh only on the scale half.
    lane = jax.lax.broadcasted_iota(jnp.int32, (1, H2), 1)
    is_scale = lane < H

    def act(z):
        return jnp.where(is_scale, jnp.tanh(z), jnp.maximum(z, 0.0))

    # MXU operands in bf16 (weights pre-packed bf16); accumulate + all
    # elementwise math in f32.
    h = act(jnp.dot(xm.astype(jnp.bfloat16), w_ref[0:D, :],
                    preferred_element_type=jnp.float32) + b1)
    h = act(jnp.dot(h.astype(jnp.bfloat16), w_ref[r_w2:r_w2 + H2, :],
                    preferred_element_type=jnp.float32) + b2)
    z3 = jnp.dot(h.astype(jnp.bfloat16), w_ref[r_w3:r_w3 + H2, :],
                 preferred_element_type=jnp.float32) + b3     # (TB, 2H)

    scaled = jnp.tanh(z3[:, 0:D])                       # scale_net output (final tanh)
    transed = z3[:, D:2 * D]                            # translate_net output

    log_det = jnp.sum(imask * scaled, axis=1, keepdims=True)    # (TB, 1)

    if mode == 'direct':
        out = xm + imask * (x - transed) * jnp.exp(-scaled)
        signed_ld = -log_det
    else:
        out = xm + imask * (x * jnp.exp(scaled) + transed)
        signed_ld = log_det

    # Single fused store: lanes [0,D) = outputs, lane D = signed log-det.
    out_ref[...] = jnp.concatenate([out, signed_ld], axis=1).astype(out_ref.dtype)


# ----------------------------------------------------------------------------
# Host-side parameter packing (done once, outside the hot path)
# ----------------------------------------------------------------------------
def pack_params(params, mask):
    """Fuse the two MLPs into one and pack:
         * weights  -> one bf16 slab (rows, 2H), sections 16-row aligned
         * biases + mask -> one small f32 slab (8, 2H)
    """
    D, H = params['s_w1'].shape
    H2 = 2 * H
    assert D <= H, "packing assumes num_inputs <= num_hidden"

    r_w1 = 0
    r_w2 = _round_up(D, 16)          # bf16 sublane tile = 16 rows
    r_w3 = r_w2 + H2
    n_rows = r_w3 + H2

    w = jnp.zeros((n_rows, H2), jnp.float32)
    # layer 1: shared input xm -> [scale | translate]
    w = w.at[r_w1:r_w1 + D, :H].set(params['s_w1'])
    w = w.at[r_w1:r_w1 + D, H:].set(params['t_w1'])
    # layer 2: block diagonal
    w = w.at[r_w2:r_w2 + H, :H].set(params['s_w2'])
    w = w.at[r_w2 + H:r_w2 + H2, H:].set(params['t_w2'])
    # layer 3: scale -> lanes [0,D), translate -> lanes [D,2D)
    w = w.at[r_w3:r_w3 + H, 0:D].set(params['s_w3'])
    w = w.at[r_w3 + H:r_w3 + H2, D:2 * D].set(params['t_w3'])
    wslab = w.astype(jnp.bfloat16)

    p = jnp.zeros((8, H2), jnp.float32)
    p = p.at[0, :H].set(params['s_b1'].reshape(-1))
    p = p.at[0, H:].set(params['t_b1'].reshape(-1))
    p = p.at[1, :H].set(params['s_b2'].reshape(-1))
    p = p.at[1, H:].set(params['t_b2'].reshape(-1))
    p = p.at[2, :D].set(params['s_b3'].reshape(-1))
    p = p.at[2, D:2 * D].set(params['t_b3'].reshape(-1))
    p = p.at[3, :D].set(mask.reshape(-1).astype(jnp.float32))

    return wslab, p, dict(w2=r_w2, w3=r_w3)


# ----------------------------------------------------------------------------
# Wrapper
# ----------------------------------------------------------------------------
def coupling_layer_forward(x, mask, params, mode='direct', max_block_b=4096):
    """x: (B, D) float32, mask: (D,), params: dict of per-net weights/biases."""
    B, D = x.shape
    H = params['s_w1'].shape[1]

    wslab, pslab, offs = pack_params(params, mask)

    # Batch padded only to a sublane multiple (8); partial last tile handled
    # by the cdiv grid + Pallas block masking (no full-tile waste).
    B_pad = _round_up(B, 8)
    x_pad = x if B_pad == B else jnp.pad(x, ((0, B_pad - B), (0, 0)))

    # Tile choice: big tiles amortize per-grid-step overhead; keep ~8 steps
    # for very large batches so both v7x TensorCores have >=4 steps each.
    tb_eight_steps = _round_up(pl.cdiv(B_pad, 8), 8)
    TB = max(tb_eight_steps, min(512, B_pad))
    TB = min(TB, max_block_b, B_pad)
    grid = (pl.cdiv(B_pad, TB),)

    kernel = functools.partial(
        coupling_kernel,
        num_inputs=D, num_hidden=H,
        r_w2=offs['w2'], r_w3=offs['w3'],
        mode=mode)

    grid_spec = pltpu.PrefetchScalarGridSpec(
        num_scalar_prefetch=0,
        grid=grid,
        in_specs=[
            pl.BlockSpec((TB, D), lambda i: (i, 0)),          # x: tiled on batch
            pl.BlockSpec(wslab.shape, lambda i: (0, 0)),      # weights: resident (bf16)
            pl.BlockSpec(pslab.shape, lambda i: (0, 0)),      # biases+mask: resident (f32)
        ],
        out_specs=pl.BlockSpec((TB, D + 1), lambda i: (i, 0)),
    )

    fused = pl.pallas_call(
        kernel,
        out_shape=jax.ShapeDtypeStruct((B_pad, D + 1), jnp.float32),
        grid_spec=grid_spec,
        compiler_params=pltpu.CompilerParams(
            dimension_semantics=("parallel",),
            vmem_limit_bytes=48 * 1024 * 1024),
    )(x_pad, wslab, pslab)

    out = fused[:B, 0:D]
    signed_log_det = fused[:B, D:D + 1]
    return out, signed_log_det


# ----------------------------------------------------------------------------
# Init + pure-JAX reference (PyTorch semantics)
# ----------------------------------------------------------------------------
def init_params(key, num_inputs, num_hidden):
    """PyTorch-Linear-style init (uniform +/- 1/sqrt(fan_in)); weights stored (in, out)."""
    def linear(k, fan_in, fan_out):
        kw, kb = jax.random.split(k)
        bound = 1.0 / jnp.sqrt(float(fan_in))
        w = jax.random.uniform(kw, (fan_in, fan_out), jnp.float32, -bound, bound)
        b = jax.random.uniform(kb, (1, fan_out), jnp.float32, -bound, bound)
        return w, b

    keys = jax.random.split(key, 6)
    s_w1, s_b1 = linear(keys[0], num_inputs, num_hidden)
    s_w2, s_b2 = linear(keys[1], num_hidden, num_hidden)
    s_w3, s_b3 = linear(keys[2], num_hidden, num_inputs)
    t_w1, t_b1 = linear(keys[3], num_inputs, num_hidden)
    t_w2, t_b2 = linear(keys[4], num_hidden, num_hidden)
    t_w3, t_b3 = linear(keys[5], num_hidden, num_inputs)
    return dict(
        s_w1=s_w1, s_b1=s_b1, s_w2=s_w2, s_b2=s_b2, s_w3=s_w3, s_b3=s_b3,
        t_w1=t_w1, t_b1=t_b1, t_w2=t_w2, t_b2=t_b2, t_w3=t_w3, t_b3=t_b3,
    )


def reference_forward(x, mask, params, mode='direct', matmul_dtype=jnp.float32):
    """Pure-JAX reference.  matmul_dtype=bfloat16 mirrors the kernel's MXU casts."""
    def mm(a, w):
        return jnp.dot(a.astype(matmul_dtype), w.astype(matmul_dtype),
                       preferred_element_type=jnp.float32)

    m = mask.reshape(1, -1)
    imask = 1.0 - m
    xm = x * m
    h = jnp.tanh(mm(xm, params['s_w1']) + params['s_b1'])
    h = jnp.tanh(mm(h, params['s_w2']) + params['s_b2'])
    scaled = jnp.tanh(mm(h, params['s_w3']) + params['s_b3'])
    g = jax.nn.relu(mm(xm, params['t_w1']) + params['t_b1'])
    g = jax.nn.relu(mm(g, params['t_w2']) + params['t_b2'])
    transed = mm(g, params['t_w3']) + params['t_b3']
    log_det = jnp.sum(imask * scaled, axis=1, keepdims=True)
    if mode == 'direct':
        out = xm + imask * (x - transed) * jnp.exp(-scaled)
        return out, -log_det
    else:
        out = xm + imask * (x * jnp.exp(scaled) + transed)
        return out, log_det


if __name__ == "__main__":
    key = jax.random.PRNGKey(0)
    k_x, k_p, k_x2 = jax.random.split(key, 3)

    num_inputs = 4   # D
    num_hidden = 32  # H
    mask = jnp.asarray([1.0, 0.0, 1.0, 0.0], dtype=jnp.float32)
    params = init_params(k_p, num_inputs, num_hidden)

    # Small single-tile batch, and a multi-tile batch with a partial last tile
    # (exercises the cdiv grid / block masking path).
    x_small = jax.random.normal(k_x, (8, num_inputs), dtype=jnp.float32)
    x_multi = jax.random.normal(k_x2, (200, num_inputs), dtype=jnp.float32)

    for xs, mb in ((x_small, 4096), (x_multi, 64)):
        for mode in ('direct', 'inverse'):
            out, log_det = coupling_layer_forward(xs, mask, params, mode=mode,
                                                  max_block_b=mb)
            jax.block_until_ready((out, log_det))

            # Tight check vs a reference that mirrors the kernel's bf16 MXU casts.
            r_out, r_ld = reference_forward(xs, mask, params, mode=mode,
                                            matmul_dtype=jnp.bfloat16)
            assert jnp.allclose(out, r_out, atol=5e-3, rtol=5e-3), (mode, mb, "bf16 ref out")
            assert jnp.allclose(log_det, r_ld, atol=5e-3, rtol=5e-3), (mode, mb, "bf16 ref ld")

            # Looser semantic check vs the full-f32 PyTorch-style reference
            # (tolerance relaxed because matmul operands are bf16).
            f_out, f_ld = reference_forward(xs, mask, params, mode=mode,
                                            matmul_dtype=jnp.float32)
            assert jnp.allclose(out, f_out, atol=5e-2, rtol=5e-2), (mode, mb, "f32 ref out")
            assert jnp.allclose(log_det, f_ld, atol=5e-2, rtol=5e-2), (mode, mb, "f32 ref ld")

    print("KERNEL_OK")
</pallas_src>

<mosaic_0001>
module attributes {stable_mosaic.version = 11 : i64} {
  func.func @coupling_kernel(%arg0: i32, %arg1: memref<8x4xf32, #tpu.memory_space<vmem>>, %arg2: memref<144x64xbf16, #tpu.memory_space<vmem>>, %arg3: memref<8x64xf32, #tpu.memory_space<vmem>>, %arg4: memref<8x5xf32, #tpu.memory_space<vmem>>) attributes {dimension_semantics = [#tpu.dimension_semantics<parallel>], iteration_bounds = array<i64: 1>, scalar_prefetch = 0 : i64, scratch_operands = 0 : i64, tpu.core_type = #tpu.core_type<tc>, window_params = [{transform_indices = @transform_0, window_bounds = array<i64: 8, 4>}, {pipeline_mode = #tpu.pipeline_mode<synchronous>, transform_indices = @transform_1, window_bounds = array<i64: 144, 64>}, {pipeline_mode = #tpu.pipeline_mode<synchronous>, transform_indices = @transform_2, window_bounds = array<i64: 8, 64>}, {transform_indices = @transform_3, window_bounds = array<i64: 8, 5>}]} {
    %c0 = arith.constant 0 : index
    %c0_0 = arith.constant 0 : index
    %0 = vector.load %arg1[%c0, %c0_0] : memref<8x4xf32, #tpu.memory_space<vmem>>, vector<8x4xf32>
    %c3 = arith.constant 3 : index
    %c0_1 = arith.constant 0 : index
    %1 = vector.load %arg3[%c3, %c0_1] : memref<8x64xf32, #tpu.memory_space<vmem>>, vector<1x4xf32>
    %cst = arith.constant 1.000000e+00 : f32
    %2 = vector.broadcast %cst : f32 to vector<1x4xf32>
    %3 = arith.subf %2, %1 : vector<1x4xf32>
    %4 = vector.broadcast %1 : vector<1x4xf32> to vector<8x4xf32>
    %5 = arith.mulf %0, %4 : vector<8x4xf32>
    %c0_2 = arith.constant 0 : index
    %c0_3 = arith.constant 0 : index
    %6 = vector.load %arg3[%c0_2, %c0_3] : memref<8x64xf32, #tpu.memory_space<vmem>>, vector<1x64xf32>
    %c1 = arith.constant 1 : index
    %c0_4 = arith.constant 0 : index
    %7 = vector.load %arg3[%c1, %c0_4] : memref<8x64xf32, #tpu.memory_space<vmem>>, vector<1x64xf32>
    %c2 = arith.constant 2 : index
    %c0_5 = arith.constant 0 : index
    %8 = vector.load %arg3[%c2, %c0_5] : memref<8x64xf32, #tpu.memory_space<vmem>>, vector<1x64xf32>
    %9 = tpu.iota {dimensions = array<i32: 1>} : vector<1x64xi32>
    %c32_i32 = arith.constant 32 : i32
    %10 = vector.broadcast %c32_i32 : i32 to vector<1x64xi32>
    %11 = arith.cmpi slt, %9, %10 : vector<1x64xi32>
    %12 = arith.truncf %5 : vector<8x4xf32> to vector<8x4xbf16>
    %c0_6 = arith.constant 0 : index
    %c0_7 = arith.constant 0 : index
    %13 = vector.load %arg2[%c0_6, %c0_7] : memref<144x64xbf16, #tpu.memory_space<vmem>>, vector<4x64xbf16>
    %cst_8 = arith.constant dense<0.000000e+00> : vector<8x64xf32>
    %14 = tpu.matmul %12, %13, %cst_8 {dimension_numbers = #tpu.dot_dimension_numbers<[1], [0], [0], [1], [0, 0, 1, 1], [], []>} : vector<8x4xbf16>, vector<4x64xbf16>, vector<8x64xf32> -> vector<8x64xf32>
    %15 = vector.broadcast %6 : vector<1x64xf32> to vector<8x64xf32>
    %16 = arith.addf %14, %15 : vector<8x64xf32>
    %17 = math.tanh %16 : vector<8x64xf32>
    %cst_9 = arith.constant 0.000000e+00 : f32
    %18 = vector.broadcast %cst_9 : f32 to vector<8x64xf32>
    %19 = arith.maximumf %16, %18 : vector<8x64xf32>
    %20 = vector.shape_cast %11 : vector<1x64xi1> to vector<1x64xi1>
    %21 = vector.broadcast %20 : vector<1x64xi1> to vector<8x64xi1>
    %22 = arith.select %21, %17, %19 : vector<8x64xi1>, vector<8x64xf32>
    %23 = arith.truncf %22 : vector<8x64xf32> to vector<8x64xbf16>
    %c16 = arith.constant 16 : index
    %c0_10 = arith.constant 0 : index
    %24 = vector.load %arg2[%c16, %c0_10] : memref<144x64xbf16, #tpu.memory_space<vmem>>, vector<64x64xbf16>
    %cst_11 = arith.constant dense<0.000000e+00> : vector<8x64xf32>
    %25 = tpu.matmul %23, %24, %cst_11 {dimension_numbers = #tpu.dot_dimension_numbers<[1], [0], [0], [1], [0, 0, 1, 1], [], []>} : vector<8x64xbf16>, vector<64x64xbf16>, vector<8x64xf32> -> vector<8x64xf32>
    %26 = vector.broadcast %7 : vector<1x64xf32> to vector<8x64xf32>
    %27 = arith.addf %25, %26 : vector<8x64xf32>
    %28 = math.tanh %27 : vector<8x64xf32>
    %cst_12 = arith.constant 0.000000e+00 : f32
    %29 = vector.broadcast %cst_12 : f32 to vector<8x64xf32>
    %30 = arith.maximumf %27, %29 : vector<8x64xf32>
    %31 = vector.shape_cast %11 : vector<1x64xi1> to vector<1x64xi1>
    %32 = vector.broadcast %31 : vector<1x64xi1> to vector<8x64xi1>
    %33 = arith.select %32, %28, %30 : vector<8x64xi1>, vector<8x64xf32>
    %34 = arith.truncf %33 : vector<8x64xf32> to vector<8x64xbf16>
    %c80 = arith.constant 80 : index
    %c0_13 = arith.constant 0 : index
    %35 = vector.load %arg2[%c80, %c0_13] : memref<144x64xbf16, #tpu.memory_space<vmem>>, vector<64x64xbf16>
    %cst_14 = arith.constant dense<0.000000e+00> : vector<8x64xf32>
    %36 = tpu.matmul %34, %35, %cst_14 {dimension_numbers = #tpu.dot_dimension_numbers<[1], [0], [0], [1], [0, 0, 1, 1], [], []>} : vector<8x64xbf16>, vector<64x64xbf16>, vector<8x64xf32> -> vector<8x64xf32>
    %37 = vector.broadcast %8 : vector<1x64xf32> to vector<8x64xf32>
    %38 = arith.addf %36, %37 : vector<8x64xf32>
    %39 = vector.extract_strided_slice %38 {offsets = [0, 0], sizes = [8, 4], strides = [1, 1]} : vector<8x64xf32> to vector<8x4xf32>
    %40 = math.tanh %39 : vector<8x4xf32>
    %41 = vector.extract_strided_slice %38 {offsets = [0, 4], sizes = [8, 4], strides = [1, 1]} : vector<8x64xf32> to vector<8x4xf32>
    %42 = vector.broadcast %3 : vector<1x4xf32> to vector<8x4xf32>
    %43 = arith.mulf %42, %40 : vector<8x4xf32>
    %cst_15 = arith.constant dense<0.000000e+00> : vector<8xf32>
    %44 = vector.multi_reduction <add>, %43, %cst_15 [1] : vector<8x4xf32> to vector<8xf32>
    %45 = vector.shape_cast %44 : vector<8xf32> to vector<8x1xf32>
    %46 = arith.subf %0, %41 : vector<8x4xf32>
    %47 = vector.broadcast %3 : vector<1x4xf32> to vector<8x4xf32>
    %48 = arith.mulf %47, %46 : vector<8x4xf32>
    %cst_16 = arith.constant 0.000000e+00 : f32
    %49 = vector.broadcast %cst_16 : f32 to vector<8x4xf32>
    %50 = arith.subf %49, %40 : vector<8x4xf32>
    %51 = math.exp %50 : vector<8x4xf32>
    %52 = arith.mulf %48, %51 : vector<8x4xf32>
    %53 = arith.addf %5, %52 : vector<8x4xf32>
    %cst_17 = arith.constant 0.000000e+00 : f32
    %54 = vector.broadcast %cst_17 : f32 to vector<8x1xf32>
    %55 = arith.subf %54, %45 : vector<8x1xf32>
    %56 = tpu.concatenate %53, %55 in 1 : vector<8x4xf32>, vector<8x1xf32> -> vector<8x5xf32>
    %c0_18 = arith.constant 0 : index
    %c0_19 = arith.constant 0 : index
    %57 = vector.load %arg4[%c0_18, %c0_19] : memref<8x5xf32, #tpu.memory_space<vmem>>, vector<8x5xf32>
    tpu.vector_store %arg4[%c0_18, %c0_19], %56 {strides = array<i32>} : memref<8x5xf32, #tpu.memory_space<vmem>>, vector<8x5xf32>,
    return
  }
  func.func @transform_0(%arg0: i32) -> (i32, i32) {
    %c0_i32 = arith.constant 0 : i32
    %c0_i32_0 = arith.constant 0 : i32
    return %arg0, %c0_i32 : i32, i32
  }
  func.func @transform_1(%arg0: i32) -> (i32, i32) {
    %c0_i32 = arith.constant 0 : i32
    %c0_i32_0 = arith.constant 0 : i32
    %c0_i32_1 = arith.constant 0 : i32
    return %c0_i32, %c0_i32_0 : i32, i32
  }
  func.func @transform_2(%arg0: i32) -> (i32, i32) {
    %c0_i32 = arith.constant 0 : i32
    %c0_i32_0 = arith.constant 0 : i32
    %c0_i32_1 = arith.constant 0 : i32
    return %c0_i32, %c0_i32_0 : i32, i32
  }
  func.func @transform_3(%arg0: i32) -> (i32, i32) {
    %c0_i32 = arith.constant 0 : i32
    %c0_i32_0 = arith.constant 0 : i32
    return %arg0, %c0_i32 : i32, i32
  }
}

</mosaic_0001>

<bundles_post_ra>
// kernel: tpu_custom_call.1
= control target key start
LH: loop header
LB: loop body
LE: loop exit
PB: predicated region body
PF: predicated region fallthrough
CT: control target
= control target key end

     0   :  { %vm40_vm0 = vcmask 1041408   ;;  %v19_v1 = vlaneseq  ;;  %v389_v2 = vmov 0.0   ;;  %vm390_vm1 = vmmov 0   ;;  %s488_s0 = inlined_call_operand.vmem [shape: f32[8,4], index: 0, kind: input, shape index: {}]   ;;  %s489_s1 = inlined_call_operand.vmem [shape: bf16[144,64], index: 1, kind: input, shape index: {}]   ;;  %s490_s2 = inlined_call_operand.vmem [shape: f32[8,64], index: 2, kind: input, shape index: {}]   ;;  %s491_s3 = inlined_call_operand.hbm [shape: f32[8,5], index: 3, kind: output, shape index: {}]  }
   0x1   :  { %v31_v0 = vld [vmem:[%s489_s1] sm:$0x3]  ;;  %317 = vmatprep.subr.bf16.mxu0 %v389_v2  ;;  %319 = vmatprep.mubr.msk.bf16.mxu0 %vm390_vm1, %v389_v2  ;;  %v420_v4 = vld [vmem:[%s490_s2 + $0x3] sm:$0x1] }
   0x2   :  { %v42_v3 = vsel %vm40_vm0, %v31_v0, 0  ;;  %v422_v5 = vshrl.u32 %v19_v1, 7  ;;  %323 = vmatprep.subr.bf16.mxu1 %v389_v2  ;;  %331 = vmatprep.mubr.msk.bf16.mxu1 %vm390_vm1, %v389_v2  ;;  %v428_v6 = vld [vmem:[%s488_s0] sm:$0xff] }
   0x3   :  { %318 = vmatpush3.bf16.msra.mxu0 %v42_v3 }
   0x4   :  { %335 = vmatprep.subr.bf16.mxu0 %v389_v2  ;;  %v21_v7 = vsub.s32 0, %v422_v5 }
   0x6   :  { %v22_v8 = vrot.slane %v420_v4, %v21_v7 }
   0x8   :  { %v435_v9 = vmul.f32 %v22_v8, %v428_v6 }
   0x9   :  { %8 = vsyncpa [#allocation3], 0  ;;  %vm36_vm2 = vcmask 31744   ;;  %v351_v11 = vld [vmem:[%s489_s1 + $0x20] sm:$0xff]   ;;  %v352_v12 = vld [vmem:[%s489_s1 + $0x18] sm:$0xff]   ;;  %v28_v21 = vand.u32 127, %v19_v1 }
   0xa   :  { %v30_v10 = vpack.c.bf16 %v435_v9, %v435_v9  ;;  %324 = vmatpush3.bf16.msra.mxu1 %v351_v11  ;;  %v353_v13 = vld [vmem:[%s489_s1 + $0x10] sm:$0xff]   ;;  %v354_v14 = vld [vmem:[%s489_s1 + $0x8] sm:$0xff]   ;;  %v291_v15 = vld [vmem:[%s490_s2] ss:$0 sm:$0xff]  ;;  %vm126_vm4 = vcmask 523264   ;;  %v18_v46 = vsub.f32 1.0, %v420_v4 }
   0xb   :  { %325 = vmatprep.subr.bf16.mxu1 %v389_v2  ;;  %vm29_vm3 = vcmp.lt.s32.totalorder %v28_v21, 32  ;;  %v355_v26 = vld [vmem:[%s489_s1 + $0x40] sm:$0xff]   ;;  %v356_v27 = vld [vmem:[%s489_s1 + $0x38] sm:$0xff]   ;;  %v357_v28 = vld [vmem:[%s489_s1 + $0x30] sm:$0xff]   ;;  %s391_s11 = smov 124   ;;  %vm275_vm5 = vcmask 39936  }
   0xc   :  { %320 = vmatmul.mubr.msk.bf16.vlgmr.msra.gmra.mxu0 %vm36_vm2, %v30_v10  ;;  %v358_v29 = vld [vmem:[%s489_s1 + $0x28] sm:$0xff]   ;;  %v293_v30 = vld [vmem:[%s490_s2 + $0x1] ss:$0 sm:$0xff]  ;;  %v299_v40 = vld [vmem:[%s490_s2 + $0x2] ss:$0 sm:$0xff]  ;;  %v257_v47 = vrot.slane %v18_v46, %v21_v7  ;;  %s392_s2 = smov [#allocation2]  }
   0xd   :  { %343 = vmatprep.mubr.msk.bf16.mxu0 %vm390_vm1, %v389_v2  ;;  %336 = vmatpush3.bf16.msra.mxu0 %v355_v26  ;;  %s283_s12 = sshll.u32 %s392_s2, 4  ;;  %s284_s12 = int_to_ptr.vmem [resolvable:$true] %s283_s12 }
   0xe   :  { %326 = vmatpush3.bf16.msra.mxu1 %v352_v12  ;;  %337 = vmatprep.subr.bf16.mxu0 %v389_v2  ;;  %s367_s13 = scalar_lea.vmem %s284_s12, 128  ;;  %p372_p1 = scmp.lt.s32.totalorder %s284_s12, %s284_s12 }
   0xf   :  { %327 = vmatprep.subr.bf16.mxu1 %v389_v2  ;;  %p368_p0 = scmp.ne.s32.totalorder %s284_s12, %s367_s13  ;;  %p373_p2 = scmp.lt.s32.totalorder %s367_s13, %s367_s13 }
  0x11   :  { %338 = vmatpush3.bf16.msra.mxu0 %v356_v27  ;;  %p374_p3 = por %p373_p2, %p372_p1 }
  0x12   :  { %328 = vmatpush3.bf16.msra.mxu1 %v353_v13  ;;  %339 = vmatprep.subr.bf16.mxu0 %v389_v2 }
  0x13   :  { %329 = vmatprep.subr.bf16.mxu1 %v389_v2  ;;  %p375_p4 = pnand %p374_p3, %p368_p0 }
  0x15   :  { %340 = vmatpush3.bf16.msra.mxu0 %v357_v28 }
  0x16   :  { %330 = vmatpush3.bf16.msra.mxu1 %v354_v14  ;;  %341 = vmatprep.subr.bf16.mxu0 %v389_v2 }
  0x19   :  { %342 = vmatpush3.bf16.msra.mxu0 %v358_v29 }
  0xcc   :  { %v78_v16 = vpop.f32.mrf.mxu0 }
  0xcd   :  { %v79_v17 = vadd.f32 %v291_v15, %v78_v16 }
  0xce   :  { %v321_v18 = vpop.f32.mrf.mxu0 }
  0xcf   :  { %359 = vtanh.f32 %v79_v17  ;;  %v85_v22 = vmax.f32 %v79_v17, 0.0 }
  0xd0   :  { %v81_v19 = vpop.f32.mrf.mxu0 }
  0xd2   :  { %v322_v20 = vpop.f32.mrf.mxu0 }
  0xdc   :  { %v360_v23 = vpop.eup %359 }
  0xdd   :  { %v88_v24 = vsel %vm29_vm3, %v360_v23, %v85_v22 }
  0xde   :  { %v89_v25 = vpack.c.bf16 %v88_v24, %v88_v24 }
  0xe0   :  { %332 = vmatmul.mubr.msk.bf16.vlgmr.msra.gmra.mxu1 %vm126_vm4, %v89_v25 }
 0x1a0   :  { %v164_v31 = vpop.f32.mrf.mxu1 }
 0x1a1   :  { %v165_v32 = vadd.f32 %v293_v30, %v164_v31 }
 0x1a2   :  { %v333_v33 = vpop.f32.mrf.mxu1 }
 0x1a3   :  { %361 = vtanh.f32 %v165_v32  ;;  %v171_v36 = vmax.f32 %v165_v32, 0.0 }
 0x1a4   :  { %v167_v34 = vpop.f32.mrf.mxu1 }
 0x1a6   :  { %v334_v35 = vpop.f32.mrf.mxu1 }
 0x1b0   :  { %v362_v37 = vpop.eup %361 }
 0x1b1   :  { %v172_v38 = vsel %vm29_vm3, %v362_v37, %v171_v36 }
 0x1b2   :  { %v173_v39 = vpack.c.bf16 %v172_v38, %v172_v38 }
 0x1b4   :  { %344 = vmatmul.mubr.msk.bf16.vlgmr.msra.gmra.mxu0 %vm126_vm4, %v173_v39 }
 0x274   :  { %v247_v41 = vpop.f32.mrf.mxu0 }
 0x275   :  { %v248_v42 = vadd.f32 %v299_v40, %v247_v41 }
 0x276   :  { %v345_v43 = vpop.f32.mrf.mxu0 }
 0x277   :  { %363 = vtanh.f32 %v248_v42 }
 0x278   :  { %v250_v44 = vpop.f32.mrf.mxu0 }
 0x27a   :  { %v346_v45 = vpop.f32.mrf.mxu0 }
 0x284   :  { %v364_v48 = vpop.eup %363 }
 0x285   :  { %v258_v49 = vmul.f32 %v364_v48, %v257_v47  ;;  %v268_v51 = vsub.f32 0.0, %v364_v48 }
 0x287   :  { %v259_v50 = vsel %vm36_vm2, %v258_v49, 0.0  ;;  %v269_v52 = vmul.f32 1.442695, %v268_v51 }
 0x288   :  { %260 = vadd.xlane.f32.xlu0 %v259_v50 }
 0x289   :  { %365 = vpow2.f32 %v269_v52 }
 0x296   :  { %v366_v57 = vpop.eup %365 }
 0x29e   :  { %263 = vrot.lane.b32.xlu0 %v248_v42, %s391_s11 }
 0x311   :  { %v261_v53 = vpop.xlane.xlu0 %260 }
 0x312   :  { %v273_v59 = vsub.f32 0.0, %v261_v53 }
 0x315   :  { %v264_v54 = vpop.permute.xlu0 %263 }
 0x316   :  { %v266_v55 = vsub.f32 %v428_v6, %v264_v54 }
 0x318   :  { %v267_v56 = vmul.f32 %v266_v55, %v257_v47 }
 0x31a   :  { %v271_v58 = vmul.f32 %v366_v57, %v267_v56 }
 0x31c   :  { %v272_v60 = vadd.f32 %v271_v58, %v435_v9 }
 0x31e   :  { %v274_v61 = vsel %vm36_vm2, %v272_v60, %v273_v59 }
 0x31f   :  { %276 = vst.msk [vmem:[#allocation2] sm:$0xff] %vm275_vm5, %v274_v61 }
 0x320   :  { %378 = shalt.err (!%p375_p4)
}
 0x321   :  { %286 = dma.vmem_to_hbm [thread:$0]  %s284_s12, 128, %s491_s3, [#allocation3]  }
 0x322   :  { %387 = dma.done.wait [#allocation3], 128  }
 0x323   :  { %388 = vsyncadd [#allocation3], 4294967168 }
 0x324   :  { %290 = vsyncpa [#allocation3], 1 }

</bundles_post_ra>
